<compile_context>
chip_gen: v7x
topology: tpu7x:2x2x1
jax: 0.10.0
libtpu: 0.0.40
codegen_flags: <defaults>
</compile_context>

<pallas_src>
import functools

import jax
import jax.numpy as jnp
from jax import lax
from jax.experimental import pallas as pl
from jax.experimental.pallas import tpu as pltpu

TEMPERATURE = 0.1
EPS = 1e-12  # matches torch.nn.functional.normalize default eps


def _device_kind():
    try:
        return jax.devices()[0].device_kind.lower()
    except Exception:
        return ""


# ----------------------------- normalization ------------------------------- #
def _normalize_kernel(x_ref, o_ref, *, scale):
    # F.normalize(x, dim=-1): x * rsqrt(max(sum(x^2), eps^2)) == x / max(||x||, eps)
    x = x_ref[...].astype(jnp.float32)
    inv = lax.rsqrt(jnp.maximum(jnp.sum(x * x, axis=-1, keepdims=True),
                                jnp.float32(EPS * EPS)))
    o_ref[...] = (x * (inv * jnp.float32(scale))).astype(o_ref.dtype)


def _normalize_bf16(x, scale, tile):
    """Row-normalize (and scale) once, casting to bf16 for the MXU."""
    n, d = x.shape
    return pl.pallas_call(
        functools.partial(_normalize_kernel, scale=scale),
        out_shape=jax.ShapeDtypeStruct((n, d), jnp.bfloat16),
        grid_spec=pl.GridSpec(
            grid=(n // tile,),
            in_specs=[pl.BlockSpec((tile, d), lambda i: (i, 0))],
            out_specs=pl.BlockSpec((tile, d), lambda i: (i, 0)),
        ),
        compiler_params=pltpu.CompilerParams(dimension_semantics=("parallel",)),
    )(x)


# ------------------------------ main kernel -------------------------------- #
def _infonce_kernel(qn_ref, kn_ref, pn_ref, out_ref, m_ref, l_ref, *,
                    tk, n_valid, use_bf16_exp):
    j = pl.program_id(1)
    nj = pl.num_programs(1)

    @pl.when(j == 0)
    def _init():
        m_ref[...] = jnp.full(m_ref.shape, -jnp.inf, m_ref.dtype)
        l_ref[...] = jnp.zeros(l_ref.shape, l_ref.dtype)

    # (tq, tk) scaled logits on the MXU: bf16 operands, f32 accumulation.
    # 1/temperature is already folded into qn, so no (tq, tk) rescale here.
    logits = lax.dot_general(qn_ref[...], kn_ref[...],
                             (((1,), (1,)), ((), ())),
                             preferred_element_type=jnp.float32)

    if n_valid is not None:  # static: mask padded key columns out of the softmax
        col = j * tk + lax.broadcasted_iota(jnp.int32, logits.shape, 1)
        logits = jnp.where(col < n_valid, logits, jnp.float32(-1e30))

    # Online softmax accumulation over the streamed key tiles.
    m_prev = m_ref[...]
    m_new = jnp.maximum(m_prev, jnp.max(logits, axis=-1, keepdims=True))
    alpha = jnp.exp(m_prev - m_new)                                   # (tq, 1)
    shifted = logits - m_new
    if use_bf16_exp:   # bf16-capable EUP on v6e / v7x
        p = jnp.exp(shifted.astype(jnp.bfloat16)).astype(jnp.float32)
    else:
        p = jnp.exp(shifted)
    l_ref[...] = alpha * l_ref[...] + jnp.sum(p, axis=-1, keepdims=True)
    m_ref[...] = m_new

    @pl.when(j == nj - 1)
    def _finalize():
        # Positive (diagonal) logit from the row-aligned normalized key tile;
        # qn already carries the 1/temperature factor.
        qn = qn_ref[...].astype(jnp.float32)
        pn = pn_ref[...].astype(jnp.float32)
        diag = jnp.sum(qn * pn, axis=-1, keepdims=True)               # (tq, 1)
        out_ref[...] = m_ref[...] + jnp.log(l_ref[...]) - diag        # per-row CE


def _row_tile(n, base):
    # Up to `base` rows per tile; tiny batches get a single 8-aligned tile.
    return min(base, pl.cdiv(n, 8) * 8)


def info_nce_pallas(query, positive_key, temperature=TEMPERATURE, reduction="mean"):
    """InfoNCE loss, negative_keys=None path (labels = arange(N))."""
    assert query.ndim == 2 and positive_key.ndim == 2
    assert query.shape[0] == positive_key.shape[0]
    assert query.shape[-1] == positive_key.shape[-1]
    n, d = query.shape

    kind = _device_kind()
    is_v6_plus = any(t in kind for t in ("v6", "v7", "7x"))
    tq = _row_tile(n, 256 if is_v6_plus else 128)   # 128 on v5e (smaller f32 temporaries)
    tk = tq
    n_pad = pl.cdiv(n, tq) * tq

    qf = query.astype(jnp.float32)
    pf = positive_key.astype(jnp.float32)
    if n_pad != n:  # zero-pad tail rows; padded key columns are masked in-kernel
        pad = ((0, n_pad - n), (0, 0))
        qf = jnp.pad(qf, pad)
        pf = jnp.pad(pf, pad)

    # Normalize exactly once (1/T folded into the queries), cast to bf16.
    qn = _normalize_bf16(qf, 1.0 / temperature, tq)
    kn = _normalize_bf16(pf, 1.0, tq)

    grid = (n_pad // tq, n_pad // tk)

    # Generation-aware VMEM budget (v7x has only 64 MiB per TensorCore).
    est = ((2 * tq * d * 2) * 2          # qn + pn tiles, double-buffered bf16
           + 2 * tk * d * 2              # kn tile, double-buffered bf16
           + 6 * tq * tk * 4             # logits / exp / mask temporaries (f32)
           + 4 * tq * 4                  # out block + (m, l) scratch
           + (2 << 20))                  # slack
    try:
        phys = pltpu.get_tpu_info().vmem_capacity_bytes
    except Exception:
        phys = 64 * 2 ** 20              # conservative (v7x per-TC)
    vmem_limit = int(min(max(4 * est, 32 * 2 ** 20), phys * 3 // 4))

    per_row = pl.pallas_call(
        functools.partial(
            _infonce_kernel, tk=tk,
            n_valid=(n if n_pad != n else None),
            use_bf16_exp=is_v6_plus),
        out_shape=jax.ShapeDtypeStruct((n_pad, 1), jnp.float32),
        grid_spec=pltpu.PrefetchScalarGridSpec(
            num_scalar_prefetch=0,
            grid=grid,
            in_specs=[
                pl.BlockSpec((tq, d), lambda i, j: (i, 0)),  # normalized queries (1/T folded)
                pl.BlockSpec((tk, d), lambda i, j: (j, 0)),  # normalized keys, streamed over j
                pl.BlockSpec((tq, d), lambda i, j: (i, 0)),  # row-aligned positives (diag)
            ],
            # Output is written once per row tile (tiny tq*4 B store); keeping the
            # natural (tq, 1) block avoids an in-kernel sublane->lane relayout.
            out_specs=pl.BlockSpec((tq, 1), lambda i, j: (i, 0)),
            scratch_shapes=[pltpu.VMEM((tq, 1), jnp.float32),   # running max
                            pltpu.VMEM((tq, 1), jnp.float32)],  # running sum
        ),
        compiler_params=pltpu.CompilerParams(
            dimension_semantics=("parallel", "arbitrary"),
            vmem_limit_bytes=vmem_limit,
        ),
    )(qn, kn, kn)

    losses = per_row[:n, 0]
    if reduction == "none":
        return losses
    if reduction == "sum":
        return jnp.sum(losses)
    return jnp.sum(losses) / jnp.float32(n)   # 'mean'


# ------------------------------- reference --------------------------------- #
def _reference_info_nce(query, positive_key, temperature=TEMPERATURE):
    # Pure-JAX f32 reference mirroring the PyTorch code (negative_keys=None).
    def norm(x):
        return x / jnp.maximum(jnp.linalg.norm(x, axis=-1, keepdims=True), EPS)

    q = norm(query.astype(jnp.float32))
    k = norm(positive_key.astype(jnp.float32))
    logits = (q @ k.T) / temperature
    logp = jax.nn.log_softmax(logits, axis=-1)
    idx = jnp.arange(q.shape[0])
    return -jnp.mean(logp[idx, idx])


if __name__ == "__main__":
    key = jax.random.PRNGKey(0)
    k1, k2, k3, k4 = jax.random.split(key, 4)

    # Small shapes consistent with the module (batch_size, embedding_size).
    N, D = 8, 32
    query = jax.random.normal(k1, (N, D), dtype=jnp.float32)
    positive_key = jax.random.normal(k2, (N, D), dtype=jnp.float32)
    loss = info_nce_pallas(query, positive_key)
    jax.block_until_ready(loss)
    ref = _reference_info_nce(query, positive_key)
    # bf16 MXU / bf16 exp move the loss by O(1e-2) relative to the f32 reference.
    assert jnp.allclose(loss, ref, atol=2e-2, rtol=2e-2), (loss, ref)

    # Also exercise the padded / masked multi-tile path (N not a tile multiple).
    N2, D2 = 300, 64
    q2 = jax.random.normal(k3, (N2, D2), dtype=jnp.float32)
    p2 = jax.random.normal(k4, (N2, D2), dtype=jnp.float32)
    loss2 = info_nce_pallas(q2, p2)
    jax.block_until_ready(loss2)
    ref2 = _reference_info_nce(q2, p2)
    assert jnp.allclose(loss2, ref2, atol=2e-2, rtol=2e-2), (loss2, ref2)

    # TODO(synk): the 'paired'/'unpaired' negative_keys branches of info_nce are
    # not implemented; only the default forward(query, positive_key) path is.
    print("KERNEL_OK")
</pallas_src>

<mosaic_0001>
module attributes {stable_mosaic.version = 11 : i64} {
  func.func @_normalize_kernel(%arg0: i32, %arg1: memref<8x32xf32, #tpu.memory_space<vmem>>, %arg2: memref<8x32xbf16, #tpu.memory_space<vmem>>) attributes {dimension_semantics = [#tpu.dimension_semantics<parallel>], iteration_bounds = array<i64: 1>, scalar_prefetch = 0 : i64, scratch_operands = 0 : i64, tpu.core_type = #tpu.core_type<tc>, window_params = [{transform_indices = @transform_0, window_bounds = array<i64: 8, 32>}, {transform_indices = @transform_1, window_bounds = array<i64: 8, 32>}]} {
    %c0 = arith.constant 0 : index
    %c0_0 = arith.constant 0 : index
    %0 = vector.load %arg1[%c0, %c0_0] : memref<8x32xf32, #tpu.memory_space<vmem>>, vector<8x32xf32>
    %1 = arith.mulf %0, %0 : vector<8x32xf32>
    %cst = arith.constant dense<0.000000e+00> : vector<8xf32>
    %2 = vector.multi_reduction <add>, %1, %cst [1] : vector<8x32xf32> to vector<8xf32>
    %3 = vector.shape_cast %2 : vector<8xf32> to vector<8x1xf32>
    %cst_1 = arith.constant 1.000000e-24 : f32
    %4 = vector.broadcast %cst_1 : f32 to vector<8x1xf32>
    %5 = arith.maximumf %3, %4 : vector<8x1xf32>
    %6 = math.rsqrt %5 : vector<8x1xf32>
    %cst_2 = arith.constant 1.000000e+01 : f32
    %7 = vector.broadcast %cst_2 : f32 to vector<8x1xf32>
    %8 = arith.mulf %6, %7 : vector<8x1xf32>
    %9 = vector.broadcast %8 : vector<8x1xf32> to vector<8x32xf32>
    %10 = arith.mulf %0, %9 : vector<8x32xf32>
    %11 = arith.truncf %10 : vector<8x32xf32> to vector<8x32xbf16>
    %c0_3 = arith.constant 0 : index
    %c0_4 = arith.constant 0 : index
    %12 = vector.load %arg2[%c0_3, %c0_4] : memref<8x32xbf16, #tpu.memory_space<vmem>>, vector<8x32xbf16>
    tpu.vector_store %arg2[%c0_3, %c0_4], %11 {strides = array<i32>} : memref<8x32xbf16, #tpu.memory_space<vmem>>, vector<8x32xbf16>,
    return
  }
  func.func @transform_0(%arg0: i32) -> (i32, i32) {
    %c0_i32 = arith.constant 0 : i32
    %c0_i32_0 = arith.constant 0 : i32
    return %arg0, %c0_i32 : i32, i32
  }
  func.func @transform_1(%arg0: i32) -> (i32, i32) {
    %c0_i32 = arith.constant 0 : i32
    %c0_i32_0 = arith.constant 0 : i32
    return %arg0, %c0_i32 : i32, i32
  }
}

</mosaic_0001>

<bundles_post_ra>
// kernel: tpu_custom_call.1
= control target key start
LH: loop header
LB: loop body
LE: loop exit
PB: predicated region body
PF: predicated region fallthrough
CT: control target
= control target key end

     0   :  { %6 = vsyncpa [#allocation3], 0  ;;  %s137_s0 = inlined_call_operand.hbm [shape: f32[8,32], index: 0, kind: input, shape index: {}]   ;;  %s138_s1 = inlined_call_operand.hbm [shape: bf16[8,32], index: 1, kind: output, shape index: {}]  }
   0x1   :  { %7 = vsyncpa [#allocation4], 0  ;;  %s101_s6 = smov [#allocation2]   ;;  %s53_s10 = scalar_lea.hbm %s137_s0, 128 }
   0x2   :  { %s14_s7 = sshll.u32 %s101_s6, 4  ;;  %p54_p0 = scmp.ne.s32.totalorder %s137_s0, %s53_s10  ;;  %s15_s7 = int_to_ptr.vmem [resolvable:$true] %s14_s7 }
   0x3   :  { %p57_p1 = scmp.lt.u32.totalorder %s53_s10, %s137_s0 }
   0x5   :  { %p59_p2 = pnand %p57_p1, %p54_p0 }
   0x7   :  { %62 = shalt.err (!%p59_p2)
}
   0x8   :  { %s63_s15 = scalar_lea.vmem %s15_s7, 128  ;;  %p68_p4 = scmp.lt.s32.totalorder %s15_s7, %s15_s7 }
   0x9   :  { %p64_p3 = scmp.ne.s32.totalorder %s15_s7, %s63_s15  ;;  %p69_p5 = scmp.lt.s32.totalorder %s63_s15, %s63_s15 }
   0xb   :  { %p70_p6 = por %p69_p5, %p68_p4 }
   0xd   :  { %p71_p7 = pnand %p70_p6, %p64_p3 }
   0xf   :  { %74 = shalt.err (!%p71_p7)
}
  0x10   :  { %17 = dma.hbm_to_vmem [thread:$0]  %s137_s0, 128, %s15_s7, [#allocation3]  }
  0x11   :  { %97 = dma.done.wait [#allocation3], 128  }
  0x12   :  { %98 = vsyncadd [#allocation3], 4294967168  ;;  %v21_v0 = vld [vmem:[#allocation2] sm:$0xff]  ;;  %vm23_vm0 = vcmask 261120   ;;  %s102_s18 = smov [#allocation5]   ;;  %vm32_vm1 = vcmask 257024  }
  0x13   :  { %v22_v1 = vmul.f32 %v21_v0, %v21_v0  ;;  %s40_s19 = sshll.u32 %s102_s18, 4  ;;  %s41_s19 = int_to_ptr.vmem [resolvable:$true] %s40_s19 }
  0x14   :  { %s75_s0 = scalar_lea.vmem %s41_s19, 64  ;;  %p80_p9 = scmp.lt.s32.totalorder %s41_s19, %s41_s19 }
  0x15   :  { %v24_v2 = vsel %vm23_vm0, %v22_v1, 0.0  ;;  %p76_p8 = scmp.ne.s32.totalorder %s41_s19, %s75_s0  ;;  %p81_p10 = scmp.lt.s32.totalorder %s75_s0, %s75_s0 }
  0x16   :  { %25 = vadd.xlane.f32.xlu0 %v24_v2 }
  0x17   :  { %p82_p11 = por %p81_p10, %p80_p9 }
  0x19   :  { %p83_p12 = pnand %p82_p11, %p76_p8 }
  0xa3   :  { %v26_v3 = vpop.xlane.xlu0 %25 }
  0xa4   :  { %v27_v4 = vmax.f32 %v26_v3, 1e-24 }
  0xa6   :  { %51 = vrsqrt.f32 %v27_v4 }
  0xb0   :  { %v52_v5 = vpop.eup %51 }
  0xb1   :  { %v29_v6 = vmul.f32 10.0, %v52_v5 }
  0xb3   :  { %v30_v7 = vmul.f32 %v29_v6, %v21_v0 }
  0xb5   :  { %v31_v8 = vpack.c.bf16 %v30_v7, %v30_v7 }
  0xb7   :  { %33 = vst.msk [vmem:[#allocation5] sm:$0xf] %vm32_vm1, %v31_v8 }
  0xb8   :  { %86 = shalt.err (!%p83_p12)
}
  0xb9   :  { %s87_s22 = scalar_lea.hbm %s138_s1, 64 }
  0xba   :  { %p88_p13 = scmp.ne.s32.totalorder %s138_s1, %s87_s22  ;;  %p91_p0 = scmp.lt.u32.totalorder %s87_s22, %s138_s1 }
  0xbc   :  { %p93_p1 = pnand %p91_p0, %p88_p13 }
  0xbe   :  { %96 = shalt.err (!%p93_p1)
}
  0xbf   :  { %43 = dma.vmem_to_hbm [thread:$0]  %s41_s19, 64, %s138_s1, [#allocation4]  }
  0xc0   :  { %99 = dma.done.wait [#allocation4], 64  }
  0xc1   :  { %100 = vsyncadd [#allocation4], 4294967232 }
  0xc2   :  { %47 = vsyncpa [#allocation3], 1 }
  0xc3   :  { %48 = vsyncpa [#allocation4], 1 }

</bundles_post_ra>
